<compile_context>
chip_gen: v5e
topology: v5e:2x2
jax: 0.10.0
libtpu: 0.0.40
codegen_flags: <defaults>
</compile_context>

<pallas_src>
import functools

import jax
import jax.numpy as jnp
from jax.experimental import pallas as pl
from jax.experimental.pallas import tpu as pltpu

_MIB = 1024 * 1024


def _gelu_tanh(x):
    # Matches torch.nn.functional.gelu(x, approximate='tanh')
    c = 0.7978845608028654  # sqrt(2/pi)
    return 0.5 * x * (1.0 + jnp.tanh(c * (x + 0.044715 * x * x * x)))


def _round_up(a, b):
    return (a + b - 1) // b * b


def _device_kind():
    try:
        return jax.devices()[0].device_kind.lower()
    except Exception:
        return ""


def _vmem_capacity_bytes():
    try:
        cap = int(pltpu.get_tpu_info().vmem_capacity_bytes)
        if cap > 0:
            return cap
    except Exception:
        pass
    # v7x has 64 MiB per TensorCore; v5e/v6e have 128 MiB.
    return 64 * _MIB if "v7" in _device_kind() else 128 * _MIB


def _generation_defaults():
    kind = _device_kind()
    cap = _vmem_capacity_bytes()
    if "v7" in kind or cap <= 64 * _MIB:
        # 64 MiB VMEM / TC, 2 TCs per chip: small tiles + headroom + dual-TC split.
        return dict(tm=256, tn=256, two_tc=True,
                    vmem_limit=max(32 * _MIB, min(cap, 64 * _MIB) - 12 * _MIB))
    if "v6" in kind:
        # 128 MiB VMEM; flops/weight-byte ~= tm, so use a big M tile.
        return dict(tm=512, tn=512, two_tc=False,
                    vmem_limit=min(104 * _MIB, max(32 * _MIB, cap - 16 * _MIB)))
    # v5e (and unknown): 128x128 MXU, knee ~240 flop/B -> tm=256 is near-balanced.
    return dict(tm=256, tn=256, two_tc=False,
                vmem_limit=min(104 * _MIB, max(32 * _MIB, cap - 16 * _MIB)))


def _vmem_need_bytes(tm, tn, H, itemsize):
    # Double-buffered input/output tiles + f32 accumulator + f32 gate|up block.
    tiles = tm * H + H * 2 * tn + 2 * tn + tn * H + H + tm * H
    return 2 * tiles * itemsize + tm * H * 4 + tm * 2 * tn * 4


def pack_mlp_params(wg, bg, wu, bu, wd, bd):
    """One-time weight packing + I-tile planning.

    Call at weight-load/init time (NOT per forward call): the interleave below
    costs a full HBM pass over the gate/up weights.
    wg/wu: (H, I), wd: (I, H), biases: (I,) or (1, I) / (H,) or (1, H).
    """
    H, I = wg.shape
    itemsize = jnp.dtype(wg.dtype).itemsize
    cfg = _generation_defaults()
    budget = cfg["vmem_limit"]

    # ---- I-tile (tn) selection: multiple of 128, VMEM-fitting ---------------
    I128 = _round_up(I, 128)
    tn = min(cfg["tn"], I128)
    while tn > 128 and _vmem_need_bytes(cfg["tm"], tn, H, itemsize) > budget:
        tn -= 128
    # Prefer an exact divisor of the 128-padded I (less zero-padding work),
    # but never drop below tn/2.
    for cand in range(tn, max(128, tn // 2) - 1, -128):
        if I128 % cand == 0:
            tn = cand
            break
    Ip = _round_up(I128, tn)
    n_i = Ip // tn

    bg = jnp.reshape(bg, (1, -1))
    bu = jnp.reshape(bu, (1, -1))
    bd = jnp.reshape(bd, (1, -1))

    def pad_cols(a):
        return a if a.shape[-1] == Ip else jnp.pad(a, ((0, 0), (0, Ip - a.shape[-1])))

    # Zero-padded gate/up columns give gelu(0)*0 == 0 and zero-padded wd rows
    # contribute nothing to the output, so no masking is needed in the kernel.
    wg_p, wu_p = pad_cols(wg), pad_cols(wu)
    bg_p, bu_p = pad_cols(bg), pad_cols(bu)
    wd_p = wd if wd.shape[0] == Ip else jnp.pad(wd, ((0, Ip - wd.shape[0]), (0, 0)))

    # Interleave so each (H, 2*tn) I-tile carries [gate_tile | up_tile] columns.
    wgu = jnp.stack([wg_p.reshape(H, n_i, tn), wu_p.reshape(H, n_i, tn)],
                    axis=2).reshape(H, 2 * Ip)
    bgu = jnp.stack([bg_p.reshape(1, n_i, tn), bu_p.reshape(1, n_i, tn)],
                    axis=2).reshape(1, 2 * Ip)

    return dict(wgu=wgu, bgu=bgu, wd=wd_p, bd=bd,
                H=H, I=I, Ip=Ip, tn=tn, n_i=n_i, cfg=cfg)


def _mlp_kernel(x_ref, wgu_ref, bgu_ref, wd_ref, bd_ref, o_ref, acc_ref, *, tn):
    j = pl.program_id(1)  # intermediate (I) tile == reduction axis of down_proj

    @pl.when(j == 0)
    def _():
        acc_ref[...] = jnp.zeros_like(acc_ref)

    x = x_ref[...]                                                     # (tm, H)
    # Fused gate|up projection: one MXU pass over an interleaved (H, 2*tn) tile.
    gu = jnp.dot(x, wgu_ref[...], preferred_element_type=jnp.float32) + bgu_ref[...]
    gate = gu[:, :tn]                                                  # (tm, tn)
    up = gu[:, tn:]                                                    # (tm, tn)
    fuse = _gelu_tanh(gate) * up                                       # f32

    # Cast back to the weight dtype before the MXU (keeps bf16 rate for bf16
    # models); accumulation stays f32 via preferred_element_type.
    acc_ref[...] += jnp.dot(fuse.astype(wd_ref.dtype), wd_ref[...],
                            preferred_element_type=jnp.float32)

    @pl.when(j == pl.num_programs(1) - 1)
    def _():
        # TODO(synk): nn.Dropout is identity in eval/inference mode; not applied here.
        o_ref[...] = (acc_ref[...] + bd_ref[...]).astype(o_ref.dtype)


def mlp_pallas(x, params):
    """x: (B, T, H); params: output of pack_mlp_params (pre-packed weights)."""
    B, T, H = x.shape
    assert H == params["H"], "hidden size mismatch vs packed params"
    M = B * T
    itemsize = jnp.dtype(x.dtype).itemsize
    pack = max(8, 32 // itemsize)          # sublane packing: f32 -> 8, bf16 -> 16

    cfg = params["cfg"]
    tn, n_i = params["tn"], params["n_i"]
    budget = cfg["vmem_limit"]

    # ---- M-tile selection ----------------------------------------------------
    tm = min(cfg["tm"], _round_up(M, pack))
    tm = _round_up(tm, pack)
    # v7x: grid axis 0 is sharded across the 2 TensorCores -> ensure >= 2 M tiles.
    if cfg["two_tc"] and M > pack and _round_up(M, tm) // tm < 2:
        tm = _round_up(pl.cdiv(M, 2), pack)
    # Shrink until the double-buffered working set fits the VMEM budget.
    while tm > pack and _vmem_need_bytes(tm, tn, H, itemsize) > budget:
        tm -= pack
    # Prefer a tm that divides M exactly (avoids an HBM read+write pad copy of x).
    if M % tm != 0 and M % pack == 0:
        for cand in range(tm, max(pack, tm - 16 * pack) - 1, -pack):
            if M % cand == 0:
                tm = cand
                break
    Mp = _round_up(M, tm)
    n_m = Mp // tm

    x2 = x.reshape(M, H)
    if Mp != M:
        x2 = jnp.pad(x2, ((0, Mp - M), (0, 0)))

    # Weights are re-streamed once per M tile (index_maps (0, j)/(j, 0)).
    w_bytes = (params["wgu"].size + params["bgu"].size
               + params["wd"].size + params["bd"].size) * jnp.dtype(params["wgu"].dtype).itemsize
    cost = pl.CostEstimate(
        flops=6 * Mp * H * params["Ip"],      # 2 matmuls (H->I) + 1 matmul (I->H)
        transcendentals=Mp * params["Ip"],    # tanh in GELU
        bytes_accessed=(x2.size + Mp * H) * itemsize + n_m * w_bytes)

    kernel = functools.partial(_mlp_kernel, tn=tn)

    out = pl.pallas_call(
        kernel,
        out_shape=jax.ShapeDtypeStruct((Mp, H), x.dtype),
        grid_spec=pltpu.PrefetchScalarGridSpec(
            num_scalar_prefetch=0,
            grid=(n_m, n_i),
            in_specs=[
                pl.BlockSpec((tm, H), lambda i, j: (i, 0)),        # x tile
                pl.BlockSpec((H, 2 * tn), lambda i, j: (0, j)),    # [gate|up] weight
                pl.BlockSpec((1, 2 * tn), lambda i, j: (0, j)),    # [gate|up] bias
                pl.BlockSpec((tn, H), lambda i, j: (j, 0)),        # down_proj weight
                pl.BlockSpec((1, H), lambda i, j: (0, 0)),         # down_proj bias
            ],
            out_specs=pl.BlockSpec((tm, H), lambda i, j: (i, 0)),
            scratch_shapes=[pltpu.VMEM((tm, H), jnp.float32)],
        ),
        compiler_params=pltpu.CompilerParams(
            dimension_semantics=("parallel", "arbitrary"),
            vmem_limit_bytes=int(cfg["vmem_limit"])),
        cost_estimate=cost,
    )(x2, params["wgu"], params["bgu"], params["wd"], params["bd"])

    if Mp != M:
        out = out[:M]
    return out.reshape(B, T, H)


def mlp_reference(x, wg, bg, wu, bu, wd, bd):
    gate = _gelu_tanh(x @ wg + bg)
    up = x @ wu + bu
    return (gate * up) @ wd + bd


if __name__ == "__main__":
    # Config: n_embd=32, mlp_scale=4 -> intermediate=128, bias=True, dropout=0.0
    B, T, H = 2, 8, 32
    I = H * 4
    dtype = jnp.float32

    key = jax.random.PRNGKey(0)
    kx, kg, kbg, ku, kbu, kd, kbd = jax.random.split(key, 7)

    x = jax.random.normal(kx, (B, T, H), dtype)
    # PyTorch-style uniform(-1/sqrt(fan_in), 1/sqrt(fan_in)) init, deterministic.
    wg = jax.random.uniform(kg, (H, I), dtype, -1.0, 1.0) / jnp.sqrt(H)
    bg = jax.random.uniform(kbg, (1, I), dtype, -1.0, 1.0) / jnp.sqrt(H)
    wu = jax.random.uniform(ku, (H, I), dtype, -1.0, 1.0) / jnp.sqrt(H)
    bu = jax.random.uniform(kbu, (1, I), dtype, -1.0, 1.0) / jnp.sqrt(H)
    wd = jax.random.uniform(kd, (I, H), dtype, -1.0, 1.0) / jnp.sqrt(I)
    bd = jax.random.uniform(kbd, (1, H), dtype, -1.0, 1.0) / jnp.sqrt(I)

    # Pack once (init/weight-load time), then run the fused kernel.
    params = pack_mlp_params(wg, bg, wu, bu, wd, bd)
    params = jax.tree_util.tree_map(
        lambda a: jax.block_until_ready(a) if isinstance(a, jax.Array) else a, params)

    out = mlp_pallas(x, params)
    out = jax.block_until_ready(out)

    ref = mlp_reference(x.reshape(B * T, H), wg, bg, wu, bu, wd, bd).reshape(B, T, H)
    assert jnp.allclose(out, ref, atol=1e-5, rtol=1e-5), "mismatch vs reference"

    print("KERNEL_OK")
</pallas_src>

<mosaic_0001>
module attributes {stable_mosaic.version = 11 : i64} {
  func.func @_mlp_kernel(%arg0: i32, %arg1: i32, %arg2: memref<16x32xf32, #tpu.memory_space<vmem>>, %arg3: memref<32x256xf32, #tpu.memory_space<vmem>>, %arg4: memref<1x256xf32, #tpu.memory_space<vmem>>, %arg5: memref<128x32xf32, #tpu.memory_space<vmem>>, %arg6: memref<1x32xf32, #tpu.memory_space<vmem>>, %arg7: memref<16x32xf32, #tpu.memory_space<vmem>>, %arg8: memref<16x32xf32, #tpu.memory_space<vmem>>) attributes {dimension_semantics = [#tpu.dimension_semantics<parallel>, #tpu.dimension_semantics<arbitrary>], iteration_bounds = array<i64: 1, 1>, scalar_prefetch = 0 : i64, scratch_operands = 1 : i64, tpu.core_type = #tpu.core_type<tc>, window_params = [{transform_indices = @transform_0, window_bounds = array<i64: 16, 32>}, {transform_indices = @transform_1, window_bounds = array<i64: 32, 256>}, {transform_indices = @transform_2, window_bounds = array<i64: 1, 256>}, {transform_indices = @transform_3, window_bounds = array<i64: 128, 32>}, {pipeline_mode = #tpu.pipeline_mode<synchronous>, transform_indices = @transform_4, window_bounds = array<i64: 1, 32>}, {transform_indices = @transform_5, window_bounds = array<i64: 16, 32>}]} {
    %c0_i32 = arith.constant 0 : i32
    %0 = arith.cmpi eq, %arg1, %c0_i32 : i32
    %1 = arith.extui %0 : i1 to i32
    %c0_i32_0 = arith.constant 0 : i32
    %2 = arith.cmpi ne, %1, %c0_i32_0 : i32
    scf.if %2 {
      %cst_19 = arith.constant 0.000000e+00 : f32
      %33 = vector.broadcast %cst_19 : f32 to vector<16x32xf32>
      %c0_20 = arith.constant 0 : index
      %c0_21 = arith.constant 0 : index
      %34 = vector.load %arg8[%c0_20, %c0_21] : memref<16x32xf32, #tpu.memory_space<vmem>>, vector<16x32xf32>
      tpu.vector_store %arg8[%c0_20, %c0_21], %33 {strides = array<i32>} : memref<16x32xf32, #tpu.memory_space<vmem>>, vector<16x32xf32>,
    } else {
    }
    %c0 = arith.constant 0 : index
    %c0_1 = arith.constant 0 : index
    %3 = vector.load %arg2[%c0, %c0_1] : memref<16x32xf32, #tpu.memory_space<vmem>>, vector<16x32xf32>
    %c0_2 = arith.constant 0 : index
    %c0_3 = arith.constant 0 : index
    %4 = vector.load %arg3[%c0_2, %c0_3] : memref<32x256xf32, #tpu.memory_space<vmem>>, vector<32x256xf32>
    %cst = arith.constant dense<0.000000e+00> : vector<16x256xf32>
    %5 = tpu.matmul %3, %4, %cst {dimension_numbers = #tpu.dot_dimension_numbers<[1], [0], [0], [1], [0, 0, 1, 1], [], []>} : vector<16x32xf32>, vector<32x256xf32>, vector<16x256xf32> -> vector<16x256xf32>
    %c0_4 = arith.constant 0 : index
    %c0_5 = arith.constant 0 : index
    %6 = vector.load %arg4[%c0_4, %c0_5] : memref<1x256xf32, #tpu.memory_space<vmem>>, vector<1x256xf32>
    %7 = vector.broadcast %6 : vector<1x256xf32> to vector<16x256xf32>
    %8 = arith.addf %5, %7 : vector<16x256xf32>
    %9 = vector.extract_strided_slice %8 {offsets = [0, 0], sizes = [16, 128], strides = [1, 1]} : vector<16x256xf32> to vector<16x128xf32>
    %10 = vector.extract_strided_slice %8 {offsets = [0, 128], sizes = [16, 128], strides = [1, 1]} : vector<16x256xf32> to vector<16x128xf32>
    %cst_6 = arith.constant 5.000000e-01 : f32
    %11 = vector.broadcast %cst_6 : f32 to vector<16x128xf32>
    %12 = arith.mulf %11, %9 : vector<16x128xf32>
    %cst_7 = arith.constant 4.471500e-02 : f32
    %13 = vector.broadcast %cst_7 : f32 to vector<16x128xf32>
    %14 = arith.mulf %13, %9 : vector<16x128xf32>
    %15 = arith.mulf %14, %9 : vector<16x128xf32>
    %16 = arith.mulf %15, %9 : vector<16x128xf32>
    %17 = arith.addf %9, %16 : vector<16x128xf32>
    %cst_8 = arith.constant 0.797884583 : f32
    %18 = vector.broadcast %cst_8 : f32 to vector<16x128xf32>
    %19 = arith.mulf %18, %17 : vector<16x128xf32>
    %20 = math.tanh %19 : vector<16x128xf32>
    %cst_9 = arith.constant 1.000000e+00 : f32
    %21 = vector.broadcast %cst_9 : f32 to vector<16x128xf32>
    %22 = arith.addf %21, %20 : vector<16x128xf32>
    %23 = arith.mulf %12, %22 : vector<16x128xf32>
    %24 = arith.mulf %23, %10 : vector<16x128xf32>
    %c0_10 = arith.constant 0 : index
    %c0_11 = arith.constant 0 : index
    %25 = vector.load %arg8[%c0_10, %c0_11] : memref<16x32xf32, #tpu.memory_space<vmem>>, vector<16x32xf32>
    %c0_12 = arith.constant 0 : index
    %c0_13 = arith.constant 0 : index
    %26 = vector.load %arg5[%c0_12, %c0_13] : memref<128x32xf32, #tpu.memory_space<vmem>>, vector<128x32xf32>
    %cst_14 = arith.constant dense<0.000000e+00> : vector<16x32xf32>
    %27 = tpu.matmul %24, %26, %cst_14 {dimension_numbers = #tpu.dot_dimension_numbers<[1], [0], [0], [1], [0, 0, 1, 1], [], []>} : vector<16x128xf32>, vector<128x32xf32>, vector<16x32xf32> -> vector<16x32xf32>
    %28 = arith.addf %25, %27 : vector<16x32xf32>
    %c0_15 = arith.constant 0 : index
    %c0_16 = arith.constant 0 : index
    %29 = vector.load %arg8[%c0_15, %c0_16] : memref<16x32xf32, #tpu.memory_space<vmem>>, vector<16x32xf32>
    tpu.vector_store %arg8[%c0_15, %c0_16], %28 {strides = array<i32>} : memref<16x32xf32, #tpu.memory_space<vmem>>, vector<16x32xf32>,
    %c0_i32_17 = arith.constant 0 : i32
    %30 = arith.cmpi eq, %arg1, %c0_i32_17 : i32
    %31 = arith.extui %30 : i1 to i32
    %c0_i32_18 = arith.constant 0 : i32
    %32 = arith.cmpi ne, %31, %c0_i32_18 : i32
    scf.if %32 {
      %c0_19 = arith.constant 0 : index
      %c0_20 = arith.constant 0 : index
      %33 = vector.load %arg8[%c0_19, %c0_20] : memref<16x32xf32, #tpu.memory_space<vmem>>, vector<16x32xf32>
      %c0_21 = arith.constant 0 : index
      %c0_22 = arith.constant 0 : index
      %34 = vector.load %arg6[%c0_21, %c0_22] : memref<1x32xf32, #tpu.memory_space<vmem>>, vector<1x32xf32>
      %35 = vector.broadcast %34 : vector<1x32xf32> to vector<16x32xf32>
      %36 = arith.addf %33, %35 : vector<16x32xf32>
      %c0_23 = arith.constant 0 : index
      %c0_24 = arith.constant 0 : index
      %37 = vector.load %arg7[%c0_23, %c0_24] : memref<16x32xf32, #tpu.memory_space<vmem>>, vector<16x32xf32>
      tpu.vector_store %arg7[%c0_23, %c0_24], %36 {strides = array<i32>} : memref<16x32xf32, #tpu.memory_space<vmem>>, vector<16x32xf32>,
    } else {
    }
    return
  }
  func.func @transform_0(%arg0: i32, %arg1: i32) -> (i32, i32) {
    %c0_i32 = arith.constant 0 : i32
    %c0_i32_0 = arith.constant 0 : i32
    return %arg0, %c0_i32 : i32, i32
  }
  func.func @transform_1(%arg0: i32, %arg1: i32) -> (i32, i32) {
    %c0_i32 = arith.constant 0 : i32
    %c0_i32_0 = arith.constant 0 : i32
    return %c0_i32, %arg1 : i32, i32
  }
  func.func @transform_2(%arg0: i32, %arg1: i32) -> (i32, i32) {
    %c0_i32 = arith.constant 0 : i32
    %c0_i32_0 = arith.constant 0 : i32
    return %c0_i32, %arg1 : i32, i32
  }
  func.func @transform_3(%arg0: i32, %arg1: i32) -> (i32, i32) {
    %c0_i32 = arith.constant 0 : i32
    %c0_i32_0 = arith.constant 0 : i32
    return %arg1, %c0_i32 : i32, i32
  }
  func.func @transform_4(%arg0: i32, %arg1: i32) -> (i32, i32) {
    %c0_i32 = arith.constant 0 : i32
    %c0_i32_0 = arith.constant 0 : i32
    %c0_i32_1 = arith.constant 0 : i32
    return %c0_i32, %c0_i32_0 : i32, i32
  }
  func.func @transform_5(%arg0: i32, %arg1: i32) -> (i32, i32) {
    %c0_i32 = arith.constant 0 : i32
    %c0_i32_0 = arith.constant 0 : i32
    return %arg0, %c0_i32 : i32, i32
  }
}

</mosaic_0001>

<bundles_post_ra>
// kernel: tpu_custom_call.1
= control target key start
LH: loop header
LB: loop body
LE: loop exit
PB: predicated region body
PF: predicated region fallthrough
CT: control target
= control target key end

     0   :  { %s379_s0 = inlined_call_operand.vmem [shape: f32[16,32], index: 0, kind: input, shape index: {}]   ;;  %s380_s1 = inlined_call_operand.vmem [shape: f32[32,256], index: 1, kind: input, shape index: {}]   ;;  %s381_s2 = inlined_call_operand.vmem [shape: f32[1,256], index: 2, kind: input, shape index: {}]   ;;  %s382_s3 = inlined_call_operand.vmem [shape: f32[128,32], index: 3, kind: input, shape index: {}]   ;;  %s383_s4 = inlined_call_operand.vmem [shape: f32[1,32], index: 4, kind: input, shape index: {}]   ;;  %s384_s5 = inlined_call_operand.hbm [shape: f32[16,32], index: 5, kind: output, shape index: {}]  }
   0x1   :  { %v36_v0 = vld [vmem:[%s380_s1 + $0x30] sm:$0xff]  ;;  %v34_v1 = vld [vmem:[%s380_s1 + $0x20] sm:$0xff]  ;;  %v37_v3 = vld [vmem:[%s380_s1 + $0x38] sm:$0xff] }
   0x2   :  { %63 = vmatpush.msra.mxu0 %v36_v0  ;;  %v32_v2 = vld [vmem:[%s380_s1 + $0x10] sm:$0xff]  ;;  %v35_v4 = vld [vmem:[%s380_s1 + $0x28] sm:$0xff]  ;;  %86 = vmatpush.msra.mxu1 %v37_v3  ;;  %v134_v5 = vld [vmem:[%s382_s3 + $0x78] sm:$0xff] }
   0x3   :  { %v133_v6 = vld [vmem:[%s382_s3 + $0x70] sm:$0xff]  ;;  %v30_v7 = vld [vmem:[%s380_s1] sm:$0xff]  ;;  %v33_v8 = vld [vmem:[%s380_s1 + $0x18] sm:$0xff]  ;;  %135 = vmatpush.msra.mxu2 %v134_v5  ;;  %197 = vmatpush.msra.mxu3 %v134_v5 }
   0x4   :  { %64 = vmatpush.msra.mxu0 %v34_v1 }
   0x5   :  { %10 = vsyncpa [#allocation4], 0  ;;  %vm25_vm0 = vcmask 261120   ;;  %v28_v9 = vld [vmem:[%s379_s0] sm:$0xff]  ;;  %87 = vmatpush.msra.mxu1 %v35_v4  ;;  %v132_v10 = vld [vmem:[%s382_s3 + $0x68] sm:$0xff]  ;;  %136 = vmatpush.msra.mxu2 %v133_v6  ;;  %v248_v31 = vmov 0.0  }
   0x6   :  { %65 = vmatpush.msra.mxu0 %v32_v2  ;;  %v31_v11 = vld [vmem:[%s380_s1 + $0x8] sm:$0xff]  ;;  %198 = vmatpush.msra.mxu3 %v133_v6  ;;  %v131_v13 = vld [vmem:[%s382_s3 + $0x60] sm:$0xff]  ;;  %v130_v14 = vld [vmem:[%s382_s3 + $0x58] sm:$0xff]  ;;  %26 = vst.msk [vmem:[#allocation2] sm:$0xff] %vm25_vm0, %v248_v31  ;;  %s249_s19 = smov [#allocation3]   ;;  %s181_s23 = sshll.u32 %s384_s5, 4  ;;  %s182_s23 = int_to_ptr.hbm [resolvable:$true] %s181_s23 }
   0x7   :  { %88 = vmatpush.msra.mxu1 %v33_v8  ;;  %137 = vmatpush.msra.mxu2 %v132_v10  ;;  %v29_v12 = vld [vmem:[%s379_s0 + $0x8] sm:$0xff]  ;;  %v129_v15 = vld [vmem:[%s382_s3 + $0x50] sm:$0xff]  ;;  %v127_v17 = vld [vmem:[%s382_s3 + $0x40] sm:$0xff]  ;;  %27 = vst.msk [vmem:[#allocation2 + $0x8] sm:$0xff] %vm25_vm0, %v248_v31  ;;  %s179_s20 = sshll.u32 %s249_s19, 4  ;;  %s251_s0 = smov 8   ;;  %s180_s20 = int_to_ptr.vmem [resolvable:$true] %s179_s20 }
   0x8   :  { %66 = vmatpush.msra.mxu0 %v30_v7  ;;  %199 = vmatpush.msra.mxu3 %v132_v10  ;;  %v128_v16 = vld [vmem:[%s382_s3 + $0x48] sm:$0xff]  ;;  %v126_v18 = vld [vmem:[%s382_s3 + $0x38] sm:$0xff]  ;;  %v125_v19 = vld [vmem:[%s382_s3 + $0x30] sm:$0xff] }
   0x9   :  { %193 = vmatmul.msk.f32.vlgmr.msra.gmra.mxu0 %vm25_vm0, %v28_v9  ;;  %89 = vmatpush.msra.mxu1 %v31_v11  ;;  %v124_v20 = vld [vmem:[%s382_s3 + $0x28] sm:$0xff]  ;;  %v123_v21 = vld [vmem:[%s382_s3 + $0x20] sm:$0xff]  ;;  %v122_v22 = vld [vmem:[%s382_s3 + $0x18] sm:$0xff] }
   0xa   :  { %195 = vmatmul.msk.f32.vlgmr.msra.gmra.mxu1 %vm25_vm0, %v28_v9  ;;  %138 = vmatpush.msra.mxu2 %v131_v13  ;;  %v121_v23 = vld [vmem:[%s382_s3 + $0x10] sm:$0xff]  ;;  %v120_v24 = vld [vmem:[%s382_s3 + $0x8] sm:$0xff]  ;;  %v119_v25 = vld [vmem:[%s382_s3] sm:$0xff] }
   0xb   :  { %200 = vmatpush.msra.mxu3 %v131_v13  ;;  %v38_v26 = vld [vmem:[%s381_s2] sm:$0x3] }
   0xc   :  { %139 = vmatpush.msra.mxu2 %v130_v14  ;;  %v40_v27 = vperm.slane %v38_v26, 0  ;;  %v41_v42 = vperm.slane %v38_v26, 1  ;;  %v217_v62 = vld [vmem:[%s383_s4] ss:$0 sm:$0xff]  ;;  %s250_s4 = smov 128  }
   0xd   :  { %201 = vmatpush.msra.mxu3 %v130_v14  ;;  %v117_v58 = vld [vmem:[#allocation2] sm:$0xff] }
   0xe   :  { %140 = vmatpush.msra.mxu2 %v129_v15  ;;  %v118_v61 = vld [vmem:[#allocation2 + $0x8] sm:$0xff] }
   0xf   :  { %202 = vmatpush.msra.mxu3 %v129_v15 }
  0x10   :  { %141 = vmatpush.msra.mxu2 %v128_v16 }
  0x11   :  { %194 = vmatmul.msk.f32.gmra.mxu0 %vm25_vm0, %v29_v12  ;;  %203 = vmatpush.msra.mxu3 %v128_v16 }
  0x12   :  { %196 = vmatmul.msk.f32.gmra.mxu1 %vm25_vm0, %v29_v12  ;;  %142 = vmatpush.msra.mxu2 %v127_v17 }
  0x13   :  { %204 = vmatpush.msra.mxu3 %v127_v17 }
  0x14   :  { %143 = vmatpush.msra.mxu2 %v126_v18 }
  0x15   :  { %205 = vmatpush.msra.mxu3 %v126_v18 }
  0x16   :  { %144 = vmatpush.msra.mxu2 %v125_v19 }
  0x17   :  { %206 = vmatpush.msra.mxu3 %v125_v19 }
  0x18   :  { %145 = vmatpush.msra.mxu2 %v124_v20 }
  0x19   :  { %207 = vmatpush.msra.mxu3 %v124_v20 }
  0x1a   :  { %146 = vmatpush.msra.mxu2 %v123_v21 }
  0x1b   :  { %208 = vmatpush.msra.mxu3 %v123_v21 }
  0x1c   :  { %147 = vmatpush.msra.mxu2 %v122_v22 }
  0x1d   :  { %209 = vmatpush.msra.mxu3 %v122_v22 }
  0x1e   :  { %148 = vmatpush.msra.mxu2 %v121_v23 }
  0x1f   :  { %210 = vmatpush.msra.mxu3 %v121_v23 }
  0x20   :  { %149 = vmatpush.msra.mxu2 %v120_v24 }
  0x21   :  { %211 = vmatpush.msra.mxu3 %v120_v24 }
  0x22   :  { %150 = vmatpush.msra.mxu2 %v119_v25 }
  0x23   :  { %212 = vmatpush.msra.mxu3 %v119_v25 }
  0x86   :  { %v68_v28 = vpop.f32.mrf.mxu0 }
  0x87   :  { %v69_v29 = vadd.f32 %v68_v28, %v40_v27  ;;  %v91_v40 = vpop.f32.mrf.mxu1 }
  0x88   :  { %v92_v46 = vadd.f32 %v91_v40, %v41_v42 }
  0x89   :  { %v99_v30 = vmul.f32 0.044715, %v69_v29  ;;  %v97_v47 = vmul.f32 0.5, %v69_v29 }
  0x8b   :  { %v101_v32 = vmul.f32 %v99_v30, %v69_v29 }
  0x8d   :  { %v103_v33 = vmul.f32 %v101_v32, %v69_v29 }
  0x8e   :  { %v71_v34 = vpop.f32.mrf.mxu0 }
  0x8f   :  { %v72_v35 = vadd.f32 %v71_v34, %v40_v27  ;;  %v105_v36 = vadd.f32 %v103_v33, %v69_v29  ;;  %v94_v51 = vpop.f32.mrf.mxu1 }
  0x90   :  { %v95_v53 = vadd.f32 %v94_v51, %v41_v42 }
  0x91   :  { %v100_v37 = vmul.f32 0.044715, %v72_v35  ;;  %v107_v38 = vmul.f32 0.7978846, %v105_v36  ;;  %v98_v54 = vmul.f32 0.5, %v72_v35 }
  0x93   :  { %218 = vtanh.f32 %v107_v38  ;;  %v102_v39 = vmul.f32 %v100_v37, %v72_v35 }
  0x95   :  { %v104_v41 = vmul.f32 %v102_v39, %v72_v35 }
  0x97   :  { %v106_v43 = vadd.f32 %v104_v41, %v72_v35 }
  0x99   :  { %v219_v44 = vpop.eup %218  ;;  %v108_v45 = vmul.f32 0.7978846, %v106_v43 }
  0x9a   :  { %v111_v48 = vadd.f32 1.0, %v219_v44 }
  0x9b   :  { %220 = vtanh.f32 %v108_v45 }
  0x9c   :  { %v113_v49 = vmul.f32 %v111_v48, %v97_v47 }
  0x9e   :  { %v115_v50 = vmul.f32 %v113_v49, %v92_v46 }
  0xa0   :  { %151 = vmatmul.f32.vlgmr.msra.gmra.mxu2 %v115_v50 }
  0xa1   :  { %v221_v52 = vpop.eup %220 }
  0xa2   :  { %v112_v55 = vadd.f32 1.0, %v221_v52 }
  0xa4   :  { %v114_v56 = vmul.f32 %v112_v55, %v98_v54 }
  0xa6   :  { %v116_v57 = vmul.f32 %v114_v56, %v95_v53 }
  0xa8   :  { %154 = vmatmul.f32.vlgmr.msra.gmra.mxu3 %v116_v57 }
 0x123   :  { %v152_v59 = vpop.f32.mrf.mxu2 }
 0x124   :  { %v158_v60 = vadd.f32 %v152_v59, %v117_v58 }
 0x126   :  { %160 = vst.msk [vmem:[#allocation2] sm:$0xff] %vm25_vm0, %v158_v60 }
 0x12b   :  { %v155_v63 = vpop.f32.mrf.mxu3 }
 0x12c   :  { %v159_v0 = vadd.f32 %v155_v63, %v118_v61 }
 0x12d   :  { %v165_v1 = vld [vmem:[#allocation2] sm:$0xff] }
 0x12e   :  { %161 = vst.msk [vmem:[#allocation2 + $0x8] sm:$0xff] %vm25_vm0, %v159_v0  ;;  %v171_v2 = vadd.f32 %v217_v62, %v165_v1 }
 0x130   :  { %173 = vst.msk [vmem:[#allocation3] sm:$0xff] %vm25_vm0, %v171_v2 }
 0x135   :  { %v166_v3 = vld [vmem:[#allocation2 + $0x8] sm:$0xff] }
 0x136   :  { %v172_v4 = vadd.f32 %v217_v62, %v166_v3 }
 0x138   :  { %174 = vst.msk [vmem:[#allocation3 + $0x8] sm:$0xff] %vm25_vm0, %v172_v4 }
 0x139   :  { %187 = dma.vmem_to_hbm [thread:$0]  %s180_s20, 256, %s182_s23, [#allocation4], %s250_s4, %s250_s4, %s251_s0  }
 0x13a   :  { %246 = dma.done.wait [#allocation4], 256  }
 0x13b   :  { %247 = vsyncadd [#allocation4], 4294967040 }
 0x13c   :  { %192 = vsyncpa [#allocation4], 1 }

</bundles_post_ra>
